<compile_context>
chip_gen: v6e
topology: v6e:2x2x1
jax: 0.10.0
libtpu: 0.0.40
codegen_flags: <defaults>
</compile_context>

<pallas_src>
import jax
import jax.numpy as jnp
from jax.experimental import pallas as pl
from jax.experimental.pallas import tpu as pltpu


def _round_up(x, m):
    return (x + m - 1) // m * m


def _tensorcores_per_chip():
    """Best-effort TC/chip count (v7x has 2; v5e/v6e have 1)."""
    try:
        kind = jax.devices()[0].device_kind.lower()
    except Exception:
        return 1
    return 2 if ("v7" in kind or "7x" in kind) else 1


def _pick_tn(N, B, n_tc):
    """Lane tile: largest multiple of 128 dividing N (cap 1024)."""
    tn = None
    for cand in (1024, 512, 256, 128):
        if N % cand == 0:
            tn = cand
            break
    if tn is None:
        # N has no multiple-of-128 divisor among the candidates.
        if N <= 2048:
            tn = N          # single block; partial-lane tail store is cheap
        else:
            tn = 512        # wrapper pads N up to a multiple of 512
    # v7x only: make sure both TensorCores get work when B == 1.
    if n_tc >= 2 and B == 1 and N <= tn and tn % 256 == 0:
        tn //= 2
    return tn


def _make_kernel(K):
    """Kernel over refs: [ctrl_0..ctrl_{K-1}, mask_0.., w_0.., b_0.., out]."""

    def kernel(*refs):
        x_refs = refs[0:K]            # each (1, d_k, tn)
        m_refs = refs[K:2 * K]        # each (1, 1, tn)
        w_refs = refs[2 * K:3 * K]    # each (D, d_k)   resident
        b_refs = refs[3 * K:4 * K]    # each (D, 1)     resident
        o_ref = refs[4 * K]           # (1, D, tn)

        acc = None
        for k in range(K):
            x = x_refs[k][0]          # [d_k, tn]
            m = m_refs[k][0]          # [1, tn]
            w = w_refs[k][...]        # [D, d_k]
            b = b_refs[k][...]        # [D, 1]
            # MXU matmul in the native (output-major) orientation; mask/bias on
            # the VPU (it has slack - the kernel is HBM-bound everywhere).
            y = jnp.dot(w, x, preferred_element_type=jnp.float32)  # [D, tn]
            y = (y + b) * m
            acc = y if acc is None else acc + y
        o_ref[0] = acc.astype(o_ref.dtype)

    return kernel


def control_encoder(embedding, ctrls, ctrl_masks, weights, biases, *, tn=None):
    """embedding: [B, D, N] (only shape/dtype used, like torch.zeros_like);
    ctrls[k]: [B, d_k, N]; ctrl_masks[k]: [B, N];
    weights[k]: [D, d_k] (torch nn.Linear layout); biases[k]: [D].
    Returns [B, D, N] in the module's native layout."""
    keys = sorted(ctrls.keys())
    assert sorted(ctrl_masks.keys()) == keys, "ctrl_masks keys do not match"
    assert sorted(weights.keys()) == keys, "encoder keys do not match"
    assert sorted(biases.keys()) == keys, "bias keys do not match"

    B, D, N = embedding.shape
    dims = []
    for k in keys:
        c = ctrls[k]
        mk = ctrl_masks[k]
        assert c.shape[0] == B and c.shape[-1] == N, "ctrls should match x along time"
        assert mk.ndim == 2 and mk.shape == (B, N), "ctrlmask should be 2d [B, N]"
        assert weights[k].shape == (D, c.shape[1])
        dims.append(c.shape[1])
    K = len(keys)

    n_tc = _tensorcores_per_chip()
    if tn is None:
        tn = _pick_tn(N, B, n_tc)
    Np = _round_up(N, tn)

    # ---- native-layout inputs (no transpose / concat / dtype repack passes)
    x_list = [ctrls[k] for k in keys]                                  # [B,d_k,N]
    m_list = [ctrl_masks[k].reshape(B, 1, N).astype(jnp.float32) for k in keys]
    w_list = [weights[k] for k in keys]                                # [D,d_k]
    b_list = [biases[k].reshape(D, 1).astype(jnp.float32) for k in keys]

    if Np != N:  # rare: huge N that is not a multiple of 128
        pad = ((0, 0), (0, 0), (0, Np - N))
        x_list = [jnp.pad(x, pad) for x in x_list]
        m_list = [jnp.pad(m, pad) for m in m_list]   # zero mask -> zero output

    grid = (B, Np // tn)
    out_dtype = embedding.dtype

    in_specs = []
    for d in dims:   # control features: token tile on lanes, full d_k on sublanes
        in_specs.append(pl.BlockSpec((1, d, tn), lambda b, j: (b, 0, j)))
    for _ in keys:   # per-control masks
        in_specs.append(pl.BlockSpec((1, 1, tn), lambda b, j: (b, 0, j)))
    for d in dims:   # resident weights
        in_specs.append(pl.BlockSpec((D, d), lambda b, j: (0, 0)))
    for _ in keys:   # resident biases
        in_specs.append(pl.BlockSpec((D, 1), lambda b, j: (0, 0)))
    out_spec = pl.BlockSpec((1, D, tn), lambda b, j: (b, 0, j))

    # ---- VMEM budget: double-buffered tiles + resident params + f32 acc slack
    out_bytes = jnp.dtype(out_dtype).itemsize
    tiles = 0
    for x in x_list:
        tiles += 2 * x.shape[1] * tn * jnp.dtype(x.dtype).itemsize
    tiles += 2 * K * tn * 4                      # masks
    tiles += 2 * D * tn * out_bytes              # output tile
    params = 2 * sum(D * d * 4 + D * 4 for d in dims)
    acc_scratch = 2 * D * tn * 4
    vmem_limit = int(min(max(4 * (tiles + params + acc_scratch), 8 << 20), 48 << 20))

    out = pl.pallas_call(
        _make_kernel(K),
        out_shape=jax.ShapeDtypeStruct((B, D, Np), out_dtype),
        grid_spec=pltpu.PrefetchScalarGridSpec(
            num_scalar_prefetch=0,
            grid=grid,
            in_specs=in_specs,
            out_specs=out_spec,
        ),
        compiler_params=pltpu.CompilerParams(
            dimension_semantics=("parallel", "parallel"),
            vmem_limit_bytes=vmem_limit,
        ),
    )(*x_list, *m_list, *w_list, *b_list)

    if Np != N:
        out = out[:, :, :N]
    return out   # already [B, D, N]; no wrapper transpose / reshape


def _ref_control_encoder(embedding, ctrls, ctrl_masks, weights, biases):
    """Pure-JAX mirror of the PyTorch forward (inference mode)."""
    out = jnp.zeros(embedding.shape, jnp.float32)
    for k in sorted(ctrls.keys()):
        ctrld = jnp.transpose(ctrls[k], (0, 2, 1))                        # b n d
        emb = jnp.einsum("bnd,ed->bne", ctrld, weights[k]) + biases[k]    # linear
        emb = jnp.transpose(emb, (0, 2, 1))                               # b e n
        out = out + emb * ctrl_masks[k][:, None, :]
    return out.astype(embedding.dtype)


if __name__ == "__main__":
    key = jax.random.PRNGKey(0)
    B, N, D = 2, 64, 128                      # batch, time, embedding_dim
    ctrl_dims = {"chroma": 12, "rms": 4}

    all_keys = jax.random.split(key, 1 + 4 * len(ctrl_dims))
    embedding = jax.random.normal(all_keys[0], (B, D, N), jnp.float32)

    ctrls, ctrl_masks, weights, biases = {}, {}, {}, {}
    for i, (name, d) in enumerate(sorted(ctrl_dims.items())):
        kc, km, kw, kb = all_keys[1 + 4 * i: 1 + 4 * i + 4]
        ctrls[name] = jax.random.normal(kc, (B, d, N), jnp.float32)
        ctrl_masks[name] = (jax.random.uniform(km, (B, N)) > 0.3).astype(jnp.float32)
        weights[name] = 0.02 * jax.random.normal(kw, (D, d), jnp.float32)
        biases[name] = 0.02 * jax.random.normal(kb, (D,), jnp.float32)

    out = control_encoder(embedding, ctrls, ctrl_masks, weights, biases)
    out = jax.block_until_ready(out)

    ref = _ref_control_encoder(embedding, ctrls, ctrl_masks, weights, biases)
    assert out.shape == embedding.shape
    # All-f32 compute -> tight tolerance vs the f32 reference.
    assert jnp.allclose(out, ref, atol=1e-3, rtol=1e-3), float(
        jnp.max(jnp.abs(out - ref)))

    print("KERNEL_OK")
</pallas_src>

<mosaic_0001>
module attributes {stable_mosaic.version = 11 : i64} {
  func.func @kernel(%arg0: i32, %arg1: i32, %arg2: memref<1x12x64xf32, #tpu.memory_space<vmem>>, %arg3: memref<1x4x64xf32, #tpu.memory_space<vmem>>, %arg4: memref<1x1x64xf32, #tpu.memory_space<vmem>>, %arg5: memref<1x1x64xf32, #tpu.memory_space<vmem>>, %arg6: memref<128x12xf32, #tpu.memory_space<vmem>>, %arg7: memref<128x4xf32, #tpu.memory_space<vmem>>, %arg8: memref<128x1xf32, #tpu.memory_space<vmem>>, %arg9: memref<128x1xf32, #tpu.memory_space<vmem>>, %arg10: memref<1x128x64xf32, #tpu.memory_space<vmem>>) attributes {dimension_semantics = [#tpu.dimension_semantics<parallel>, #tpu.dimension_semantics<parallel>], iteration_bounds = array<i64: 2, 1>, scalar_prefetch = 0 : i64, scratch_operands = 0 : i64, tpu.core_type = #tpu.core_type<tc>, window_params = [{transform_indices = @transform_0, window_bounds = array<i64: 1, 12, 64>}, {transform_indices = @transform_1, window_bounds = array<i64: 1, 4, 64>}, {transform_indices = @transform_2, window_bounds = array<i64: 1, 1, 64>}, {transform_indices = @transform_3, window_bounds = array<i64: 1, 1, 64>}, {pipeline_mode = #tpu.pipeline_mode<synchronous>, transform_indices = @transform_4, window_bounds = array<i64: 128, 12>}, {pipeline_mode = #tpu.pipeline_mode<synchronous>, transform_indices = @transform_5, window_bounds = array<i64: 128, 4>}, {pipeline_mode = #tpu.pipeline_mode<synchronous>, transform_indices = @transform_6, window_bounds = array<i64: 128, 1>}, {pipeline_mode = #tpu.pipeline_mode<synchronous>, transform_indices = @transform_7, window_bounds = array<i64: 128, 1>}, {transform_indices = @transform_8, window_bounds = array<i64: 1, 128, 64>}]} {
    %c0 = arith.constant 0 : index
    %c0_0 = arith.constant 0 : index
    %c0_1 = arith.constant 0 : index
    %0 = vector.load %arg2[%c0, %c0_0, %c0_1] : memref<1x12x64xf32, #tpu.memory_space<vmem>>, vector<1x12x64xf32>
    %1 = vector.shape_cast %0 : vector<1x12x64xf32> to vector<12x64xf32>
    %c0_2 = arith.constant 0 : index
    %c0_3 = arith.constant 0 : index
    %c0_4 = arith.constant 0 : index
    %2 = vector.load %arg4[%c0_2, %c0_3, %c0_4] : memref<1x1x64xf32, #tpu.memory_space<vmem>>, vector<1x1x64xf32>
    %3 = vector.shape_cast %2 : vector<1x1x64xf32> to vector<1x64xf32>
    %c0_5 = arith.constant 0 : index
    %c0_6 = arith.constant 0 : index
    %4 = vector.load %arg6[%c0_5, %c0_6] : memref<128x12xf32, #tpu.memory_space<vmem>>, vector<128x12xf32>
    %c0_7 = arith.constant 0 : index
    %c0_8 = arith.constant 0 : index
    %5 = vector.load %arg8[%c0_7, %c0_8] : memref<128x1xf32, #tpu.memory_space<vmem>>, vector<128x1xf32>
    %cst = arith.constant dense<0.000000e+00> : vector<128x64xf32>
    %6 = tpu.matmul %4, %1, %cst {dimension_numbers = #tpu.dot_dimension_numbers<[1], [0], [0], [1], [0, 0, 1, 1], [], []>} : vector<128x12xf32>, vector<12x64xf32>, vector<128x64xf32> -> vector<128x64xf32>
    %7 = vector.broadcast %5 : vector<128x1xf32> to vector<128x64xf32>
    %8 = arith.addf %6, %7 : vector<128x64xf32>
    %9 = vector.broadcast %3 : vector<1x64xf32> to vector<128x64xf32>
    %10 = arith.mulf %8, %9 : vector<128x64xf32>
    %c0_9 = arith.constant 0 : index
    %c0_10 = arith.constant 0 : index
    %c0_11 = arith.constant 0 : index
    %11 = vector.load %arg3[%c0_9, %c0_10, %c0_11] : memref<1x4x64xf32, #tpu.memory_space<vmem>>, vector<1x4x64xf32>
    %12 = vector.shape_cast %11 : vector<1x4x64xf32> to vector<4x64xf32>
    %c0_12 = arith.constant 0 : index
    %c0_13 = arith.constant 0 : index
    %c0_14 = arith.constant 0 : index
    %13 = vector.load %arg5[%c0_12, %c0_13, %c0_14] : memref<1x1x64xf32, #tpu.memory_space<vmem>>, vector<1x1x64xf32>
    %14 = vector.shape_cast %13 : vector<1x1x64xf32> to vector<1x64xf32>
    %c0_15 = arith.constant 0 : index
    %c0_16 = arith.constant 0 : index
    %15 = vector.load %arg7[%c0_15, %c0_16] : memref<128x4xf32, #tpu.memory_space<vmem>>, vector<128x4xf32>
    %c0_17 = arith.constant 0 : index
    %c0_18 = arith.constant 0 : index
    %16 = vector.load %arg9[%c0_17, %c0_18] : memref<128x1xf32, #tpu.memory_space<vmem>>, vector<128x1xf32>
    %cst_19 = arith.constant dense<0.000000e+00> : vector<128x64xf32>
    %17 = tpu.matmul %15, %12, %cst_19 {dimension_numbers = #tpu.dot_dimension_numbers<[1], [0], [0], [1], [0, 0, 1, 1], [], []>} : vector<128x4xf32>, vector<4x64xf32>, vector<128x64xf32> -> vector<128x64xf32>
    %18 = vector.broadcast %16 : vector<128x1xf32> to vector<128x64xf32>
    %19 = arith.addf %17, %18 : vector<128x64xf32>
    %20 = vector.broadcast %14 : vector<1x64xf32> to vector<128x64xf32>
    %21 = arith.mulf %19, %20 : vector<128x64xf32>
    %22 = arith.addf %10, %21 : vector<128x64xf32>
    %c0_20 = arith.constant 0 : index
    %c0_21 = arith.constant 0 : index
    %c0_22 = arith.constant 0 : index
    %23 = vector.load %arg10[%c0_20, %c0_21, %c0_22] : memref<1x128x64xf32, #tpu.memory_space<vmem>>, vector<1x128x64xf32>
    %24 = vector.shape_cast %23 : vector<1x128x64xf32> to vector<128x64xf32>
    %25 = vector.shape_cast %22 : vector<128x64xf32> to vector<1x128x64xf32>
    tpu.vector_store %arg10[%c0_20, %c0_21, %c0_22], %25 {strides = array<i32>} : memref<1x128x64xf32, #tpu.memory_space<vmem>>, vector<1x128x64xf32>,
    return
  }
  func.func @transform_0(%arg0: i32, %arg1: i32) -> (i32, i32, i32) {
    %c0_i32 = arith.constant 0 : i32
    %c0_i32_0 = arith.constant 0 : i32
    return %arg0, %c0_i32, %arg1 : i32, i32, i32
  }
  func.func @transform_1(%arg0: i32, %arg1: i32) -> (i32, i32, i32) {
    %c0_i32 = arith.constant 0 : i32
    %c0_i32_0 = arith.constant 0 : i32
    return %arg0, %c0_i32, %arg1 : i32, i32, i32
  }
  func.func @transform_2(%arg0: i32, %arg1: i32) -> (i32, i32, i32) {
    %c0_i32 = arith.constant 0 : i32
    %c0_i32_0 = arith.constant 0 : i32
    return %arg0, %c0_i32, %arg1 : i32, i32, i32
  }
  func.func @transform_3(%arg0: i32, %arg1: i32) -> (i32, i32, i32) {
    %c0_i32 = arith.constant 0 : i32
    %c0_i32_0 = arith.constant 0 : i32
    return %arg0, %c0_i32, %arg1 : i32, i32, i32
  }
  func.func @transform_4(%arg0: i32, %arg1: i32) -> (i32, i32) {
    %c0_i32 = arith.constant 0 : i32
    %c0_i32_0 = arith.constant 0 : i32
    %c0_i32_1 = arith.constant 0 : i32
    return %c0_i32, %c0_i32_0 : i32, i32
  }
  func.func @transform_5(%arg0: i32, %arg1: i32) -> (i32, i32) {
    %c0_i32 = arith.constant 0 : i32
    %c0_i32_0 = arith.constant 0 : i32
    %c0_i32_1 = arith.constant 0 : i32
    return %c0_i32, %c0_i32_0 : i32, i32
  }
  func.func @transform_6(%arg0: i32, %arg1: i32) -> (i32, i32) {
    %c0_i32 = arith.constant 0 : i32
    %c0_i32_0 = arith.constant 0 : i32
    %c0_i32_1 = arith.constant 0 : i32
    return %c0_i32, %c0_i32_0 : i32, i32
  }
  func.func @transform_7(%arg0: i32, %arg1: i32) -> (i32, i32) {
    %c0_i32 = arith.constant 0 : i32
    %c0_i32_0 = arith.constant 0 : i32
    %c0_i32_1 = arith.constant 0 : i32
    return %c0_i32, %c0_i32_0 : i32, i32
  }
  func.func @transform_8(%arg0: i32, %arg1: i32) -> (i32, i32, i32) {
    %c0_i32 = arith.constant 0 : i32
    %c0_i32_0 = arith.constant 0 : i32
    return %arg0, %c0_i32, %arg1 : i32, i32, i32
  }
}

</mosaic_0001>

<bundles_post_ra>
// kernel: tpu_custom_call.1
= control target key start
LH: loop header
LB: loop body
LE: loop exit
PB: predicated region body
PF: predicated region fallthrough
CT: control target
= control target key end

     0   :  { %s1474_s27 = smov 0   ;;  %s1476_s28 = smov 0   ;;  %s1854_s0 = inlined_call_operand.vmem [shape: f32[2,12,64], index: 0, kind: input, shape index: {}]   ;;  %s1855_s1 = inlined_call_operand.vmem [shape: f32[2,4,64], index: 1, kind: input, shape index: {}]   ;;  %s1856_s2 = inlined_call_operand.vmem [shape: f32[2,1,64], index: 2, kind: input, shape index: {}]   ;;  %s1857_s3 = inlined_call_operand.vmem [shape: f32[2,1,64], index: 3, kind: input, shape index: {}]   ;;  %s1858_s4 = inlined_call_operand.vmem [shape: f32[128,12], index: 4, kind: input, shape index: {}]   ;;  %s1859_s5 = inlined_call_operand.vmem [shape: f32[128,4], index: 5, kind: input, shape index: {}]   ;;  %s1860_s6 = inlined_call_operand.vmem [shape: f32[128,1], index: 6, kind: input, shape index: {}]   ;;  %s1861_s7 = inlined_call_operand.vmem [shape: f32[128,1], index: 7, kind: input, shape index: {}]   ;;  %s1862_s8 = inlined_call_operand.vmem [shape: f32[2,128,64], index: 8, kind: output, shape index: {}]  }
   0x1   :  { %s1478_s29 = smov 0  }
   0x2 LB: > { %s30_s30 = sadd.s32 1, %s1422_s28  ;;  %p1242_p0 = scmp.ge.s32.totalorder %s1426_s29, 1  ;;  %s1426_s29 = sphi %s1478_s29, %s18_s29   ;;  %s1422_s28 = sphi %s1476_s28, %s1864_s28   ;;  %s1418_s27 = sphi %s1474_s27, %s1863_s27  }
   0x3   : > { %p32_p1 = scmp.ge.s32.totalorder %s30_s30, 2  ;;  %p321_p2 = scmp.lt.s32.totalorder %s1426_s29, 3 }
   0x5   : > { %s1866_s30 = smov (%p32_p1, %s30_s30), 0  ;;  %p322_p3 = pnand %p1242_p0, %p321_p2 }
   0x6   : > { %p380_p4 = scmp.lt.s32.totalorder (!%p322_p3), %s1418_s27, 1 }
   0x7   : > { %325 = sbr.rel (%p322_p3) target bundleno = 251 (0xfb), region = 52 }
   0xc   : > { %v436_v0 = vld [vmem:[%s1860_s6 + $0x10] sm:$0xff]  ;;  %v434_v1 = vld [vmem:[%s1860_s6] sm:$0xff]  ;;  %v1428_v2 = vmov 0   ;;  %vm864_vm0 = vcmask 31744   ;;  %vm530_vm1 = vcmask 97280   ;;  %s1868_s27 = smov (!%p380_p4, %s1418_s27), 1 }
   0xd   : > { %1403 = vset.pattern.permute.xlu1 %v1428_v2  ;;  %1402 = vset.pattern.permute.xlu0 %v1428_v2  ;;  %v752_v3 = vld [vmem:[%s1859_s5] sm:$0xff]  ;;  %v437_v5 = vld [vmem:[%s1860_s6 + $0x18] sm:$0xff]  ;;  %v435_v6 = vld [vmem:[%s1860_s6 + $0x8] sm:$0xff]  ;;  %s1286_s21 = sshll.u32 %s1868_s27, 4  ;;  %vm579_vm2 = vcmask 1043456   ;;  %s1245_s25 = sshll.u32 %s1868_s27, 2 }
   0xe   : > { %462 = vperm.xlu1 %1403, %v436_v0   ;;  %452 = vperm.xlu0 %1402, %v434_v1   ;;  %v418_v4 = vld [vmem:[%s1858_s4] sm:$0xff]  ;;  %s387_s24 = scalar_lea.vmem %s1854_s0, %s1286_s21  ;;  %s394_s10 = scalar_lea.vmem %s1855_s1, %s1245_s25  ;;  %v439_v9 = vld [vmem:[%s1860_s6 + $0x28] sm:$0xff]  ;;  %v754_v13 = vld [vmem:[%s1859_s5 + $0x10] sm:$0xff]  ;;  %vm1099_vm3 = vcmask 523264  }
   0xf   : > { %1353 = vmatprep.mubr.msk.f32.mxu1 %vm864_vm0, %v752_v3  ;;  %1327 = vmatprep.mubr.msk.f32.mxu0 %vm530_vm1, %v418_v4  ;;  %v416_v7 = vld [vmem:[%s387_s24 + $0x8] sm:$0xf]  ;;  %v415_v8 = vld [vmem:[%s387_s24] sm:$0xff]  ;;  %v441_v15 = vld [vmem:[%s1860_s6 + $0x38] sm:$0xff]  ;;  %s400_s21 = scalar_lea.vmem %s1856_s2, %s1868_s27  ;;  %s406_s24 = scalar_lea.vmem %s1857_s3, %s1868_s27 }
  0x10   : > { %1323 = vmatprep.subr.msk.mxu0 %vm579_vm2, %v416_v7  ;;  %v750_v10 = vld [vmem:[%s394_s10] sm:$0xf]  ;;  %v753_v11 = vld [vmem:[%s1859_s5 + $0x8] sm:$0xff]  ;;  %v420_v16 = vld [vmem:[%s1858_s4 + $0x10] sm:$0xff]  ;;  %s1287_s25 = sshll.u32 %s1868_s27, 7 }
  0x11   : > { %1324 = vmatpush3.msk.msra.mxu0 %vm579_vm2, %v416_v7  ;;  %v438_v12 = vld [vmem:[%s1860_s6 + $0x20] sm:$0xff]  ;;  %1351 = vmatprep.subr.msk.mxu1 %vm579_vm2, %v750_v10  ;;  %v419_v14 = vld [vmem:[%s1858_s4 + $0x8] sm:$0xff]  ;;  %v755_v17 = vld [vmem:[%s1859_s5 + $0x18] sm:$0xff]  ;;  %s1770_s10 = scalar_lea.vmem %s1862_s8, %s1287_s25 }
  0x12   : > { %467 = vperm.xlu1 %1403, %v437_v5   ;;  %457 = vperm.xlu0 %1402, %v435_v6   ;;  %v440_v18 = vld [vmem:[%s1860_s6 + $0x30] sm:$0xff]  ;;  %v756_v19 = vld [vmem:[%s1859_s5 + $0x20] sm:$0xff]  ;;  %v421_v20 = vld [vmem:[%s1858_s4 + $0x18] sm:$0xff] }
  0x13   : > { %1325 = vmatprep.subr.mxu0 %v415_v8  ;;  %1352 = vmatpush3.msk.msra.mxu1 %vm579_vm2, %v750_v10  ;;  %v443_v21 = vld [vmem:[%s1860_s6 + $0x48] sm:$0xff]  ;;  %v422_v22 = vld [vmem:[%s1858_s4 + $0x20] sm:$0xff]  ;;  %v758_v25 = vld [vmem:[%s1859_s5 + $0x30] sm:$0xff] }
  0x14   : > { %1354 = vmatmul.mubr.msk.f32.vlgmr.msra.gmra.mxu1 %vm864_vm0, %v753_v11  ;;  %1326 = vmatpush3.msra.mxu0 %v415_v8  ;;  %v757_v23 = vld [vmem:[%s1859_s5 + $0x28] sm:$0xff]  ;;  %v442_v24 = vld [vmem:[%s1860_s6 + $0x40] sm:$0xff]  ;;  %v445_v27 = vld [vmem:[%s1860_s6 + $0x58] sm:$0xff] }
  0x15   : > { %1356 = vmatprep.mubr.msk.f32.mxu1 %vm864_vm0, %v754_v13  ;;  %1328 = vmatmul.mubr.msk.f32.vlgmr.msra.gmra.mxu0 %vm530_vm1, %v419_v14  ;;  %v423_v26 = vld [vmem:[%s1858_s4 + $0x28] sm:$0xff]  ;;  %v424_v28 = vld [vmem:[%s1858_s4 + $0x30] sm:$0xff]  ;;  %v759_v29 = vld [vmem:[%s1859_s5 + $0x38] sm:$0xff] }
  0x16   : > { %477 = vperm.xlu1 %1403, %v439_v9   ;;  %472 = vperm.xlu0 %1402, %v438_v12   ;;  %v444_v30 = vld [vmem:[%s1860_s6 + $0x50] sm:$0xff]  ;;  %v760_v31 = vld [vmem:[%s1859_s5 + $0x40] sm:$0xff]  ;;  %v425_v32 = vld [vmem:[%s1858_s4 + $0x38] sm:$0xff] }
  0x17   : > { %1330 = vmatprep.mubr.msk.f32.mxu0 %vm530_vm1, %v420_v16  ;;  %v447_v33 = vld [vmem:[%s1860_s6 + $0x68] sm:$0xff]  ;;  %v426_v34 = vld [vmem:[%s1858_s4 + $0x40] sm:$0xff]  ;;  %v762_v37 = vld [vmem:[%s1859_s5 + $0x50] sm:$0xff] }
  0x18   : > { %1357 = vmatmul.mubr.msk.f32.gmra.mxu1 %vm864_vm0, %v755_v17  ;;  %v761_v35 = vld [vmem:[%s1859_s5 + $0x48] sm:$0xff]  ;;  %v446_v36 = vld [vmem:[%s1860_s6 + $0x60] sm:$0xff]  ;;  %v449_v39 = vld [vmem:[%s1860_s6 + $0x78] sm:$0xff] }
  0x19   : > { %1359 = vmatprep.mubr.msk.f32.mxu1 %vm864_vm0, %v756_v19  ;;  %1331 = vmatmul.mubr.msk.f32.gmra.mxu0 %vm530_vm1, %v421_v20  ;;  %v427_v38 = vld [vmem:[%s1858_s4 + $0x48] sm:$0xff]  ;;  %v428_v40 = vld [vmem:[%s1858_s4 + $0x50] sm:$0xff]  ;;  %v763_v41 = vld [vmem:[%s1859_s5 + $0x58] sm:$0xff] }
  0x1a   : > { %487 = vperm.xlu1 %1403, %v441_v15   ;;  %482 = vperm.xlu0 %1402, %v440_v18   ;;  %v448_v42 = vld [vmem:[%s1860_s6 + $0x70] sm:$0xff]  ;;  %v764_v43 = vld [vmem:[%s1859_s5 + $0x60] sm:$0xff]  ;;  %v429_v44 = vld [vmem:[%s1858_s4 + $0x58] sm:$0xff] }
  0x1b   : > { %1333 = vmatprep.mubr.msk.f32.mxu0 %vm530_vm1, %v422_v22  ;;  %v769_v45 = vld [vmem:[%s1861_s7 + $0x8] sm:$0xff]  ;;  %v430_v46 = vld [vmem:[%s1858_s4 + $0x60] sm:$0xff]  ;;  %v766_v49 = vld [vmem:[%s1859_s5 + $0x70] sm:$0xff] }
  0x1c   : > { %1360 = vmatmul.mubr.msk.f32.gmra.mxu1 %vm864_vm0, %v757_v23  ;;  %v765_v47 = vld [vmem:[%s1859_s5 + $0x68] sm:$0xff]  ;;  %v768_v48 = vld [vmem:[%s1861_s7] sm:$0xff]  ;;  %v771_v51 = vld [vmem:[%s1861_s7 + $0x18] sm:$0xff] }
  0x1d   : > { %1362 = vmatprep.mubr.msk.f32.mxu1 %vm864_vm0, %v758_v25  ;;  %1334 = vmatmul.mubr.msk.f32.gmra.mxu0 %vm530_vm1, %v423_v26  ;;  %v431_v50 = vld [vmem:[%s1858_s4 + $0x68] sm:$0xff]  ;;  %v432_v52 = vld [vmem:[%s1858_s4 + $0x70] sm:$0xff]  ;;  %v767_v53 = vld [vmem:[%s1859_s5 + $0x78] sm:$0xff] }
  0x1e   : > { %497 = vperm.xlu1 %1403, %v443_v21   ;;  %492 = vperm.xlu0 %1402, %v442_v24   ;;  %v770_v54 = vld [vmem:[%s1861_s7 + $0x10] sm:$0xff]  ;;  %v433_v55 = vld [vmem:[%s1858_s4 + $0x78] sm:$0xff]  ;;  %v773_v56 = vld [vmem:[%s1861_s7 + $0x28] sm:$0xff] }
  0x1f   : > { %1336 = vmatprep.mubr.msk.f32.mxu0 %vm530_vm1, %v424_v28  ;;  %v772_v57 = vld [vmem:[%s1861_s7 + $0x20] sm:$0xff]  ;;  %v775_v58 = vld [vmem:[%s1861_s7 + $0x38] sm:$0xff]  ;;  %v774_v59 = vld [vmem:[%s1861_s7 + $0x30] sm:$0xff] }
  0x20   : > { %1363 = vmatmul.mubr.msk.f32.gmra.mxu1 %vm864_vm0, %v759_v29  ;;  %v777_v60 = vld [vmem:[%s1861_s7 + $0x48] sm:$0xff]  ;;  %v776_v61 = vld [vmem:[%s1861_s7 + $0x40] sm:$0xff]  ;;  %v779_v62 = vld [vmem:[%s1861_s7 + $0x58] sm:$0xff] }
  0x21   : > { %1365 = vmatprep.mubr.msk.f32.mxu1 %vm864_vm0, %v760_v31  ;;  %1337 = vmatmul.mubr.msk.f32.gmra.mxu0 %vm530_vm1, %v425_v32  ;;  %v778_v63 = vld [vmem:[%s1861_s7 + $0x50] sm:$0xff]  ;;  %v781_v0 = vld [vmem:[%s1861_s7 + $0x68] sm:$0xff]  ;;  %v780_v1 = vld [vmem:[%s1861_s7 + $0x60] sm:$0xff] }
  0x22   : > { %507 = vperm.xlu1 %1403, %v445_v27   ;;  %502 = vperm.xlu0 %1402, %v444_v30   ;;  %v783_v2 = vld [vmem:[%s1861_s7 + $0x78] sm:$0xff]  ;;  %v782_v3 = vld [vmem:[%s1861_s7 + $0x70] sm:$0xff]  ;;  %v1760_v28 = vld [vmem:[%s400_s21] ss:$0 sm:$0xff] }
  0x23   : > { %1339 = vmatprep.mubr.msk.f32.mxu0 %vm530_vm1, %v426_v34  ;;  %v1762_v29 = vld [vmem:[%s406_s24] ss:$0 sm:$0xff] }
  0x24   : > { %1366 = vmatmul.mubr.msk.f32.gmra.mxu1 %vm864_vm0, %v761_v35 }
  0x25   : > { %1368 = vmatprep.mubr.msk.f32.mxu1 %vm864_vm0, %v762_v37  ;;  %1340 = vmatmul.mubr.msk.f32.gmra.mxu0 %vm530_vm1, %v427_v38 }
  0x26   : > { %517 = vperm.xlu1 %1403, %v447_v33   ;;  %512 = vperm.xlu0 %1402, %v446_v36  }
  0x27   : > { %1342 = vmatprep.mubr.msk.f32.mxu0 %vm530_vm1, %v428_v40 }
  0x28   : > { %1369 = vmatmul.mubr.msk.f32.gmra.mxu1 %vm864_vm0, %v763_v41 }
  0x29   : > { %1371 = vmatprep.mubr.msk.f32.mxu1 %vm864_vm0, %v764_v43  ;;  %1343 = vmatmul.mubr.msk.f32.gmra.mxu0 %vm530_vm1, %v429_v44 }
  0x2a   : > { %527 = vperm.xlu1 %1403, %v449_v39   ;;  %522 = vperm.xlu0 %1402, %v448_v42  }
  0x2b   : > { %1345 = vmatprep.mubr.msk.f32.mxu0 %vm530_vm1, %v430_v46 }
  0x2c   : > { %1372 = vmatmul.mubr.msk.f32.gmra.mxu1 %vm864_vm0, %v765_v47 }
  0x2d   : > { %1374 = vmatprep.mubr.msk.f32.mxu1 %vm864_vm0, %v766_v49  ;;  %1346 = vmatmul.mubr.msk.f32.gmra.mxu0 %vm530_vm1, %v431_v50 }
  0x2e   : > { %791 = vperm.xlu1 %1403, %v769_v45   ;;  %786 = vperm.xlu0 %1402, %v768_v48  }
  0x2f   : > { %1348 = vmatprep.mubr.msk.f32.mxu0 %vm530_vm1, %v432_v52 }
  0x30   : > { %1375 = vmatmul.mubr.msk.f32.gmra.mxu1 %vm864_vm0, %v767_v53 }
  0x31   : > { %1349 = vmatmul.mubr.msk.f32.gmra.mxu0 %vm530_vm1, %v433_v55 }
  0x32   : > { %801 = vperm.xlu1 %1403, %v771_v51   ;;  %796 = vperm.xlu0 %1402, %v770_v54  }
  0x36   : > { %811 = vperm.xlu1 %1403, %v773_v56   ;;  %806 = vperm.xlu0 %1402, %v772_v57  }
  0x3a   : > { %821 = vperm.xlu1 %1403, %v775_v58   ;;  %816 = vperm.xlu0 %1402, %v774_v59  }
  0x3e   : > { %831 = vperm.xlu1 %1403, %v777_v60   ;;  %826 = vperm.xlu0 %1402, %v776_v61  }
  0x42   : > { %841 = vperm.xlu1 %1403, %v779_v62   ;;  %836 = vperm.xlu0 %1402, %v778_v63  }
  0x46   : > { %851 = vperm.xlu1 %1403, %v781_v0   ;;  %846 = vperm.xlu0 %1402, %v780_v1  }
  0x4a   : > { %861 = vperm.xlu1 %1403, %v783_v2   ;;  %856 = vperm.xlu0 %1402, %v782_v3  }
  0x89   : > { %v463_v4 = vpop.permute.xlu1 %462  ;;  %v453_v5 = vpop.permute.xlu0 %452 }
  0x8d   : > { %v468_v6 = vpop.permute.xlu1 %467  ;;  %v458_v7 = vpop.permute.xlu0 %457 }
  0x91   : > { %v478_v8 = vpop.permute.xlu1 %477  ;;  %v1730_v9 = vpop.permute.xlu0 %472 }
  0x95   : > { %v1732_v10 = vpop.permute.xlu1 %487  ;;  %v1734_v11 = vpop.permute.xlu0 %482 }
  0x99   : > { %v1736_v12 = vpop.permute.xlu1 %497  ;;  %v1738_v13 = vpop.permute.xlu0 %492 }
  0x9d   : > { %v1740_v14 = vpop.permute.xlu1 %507  ;;  %v1742_v15 = vpop.permute.xlu0 %502 }
  0xa1   : > { %v1744_v16 = vpop.permute.xlu1 %517  ;;  %v1746_v17 = vpop.permute.xlu0 %512 }
  0xa5   : > { %v1748_v18 = vpop.permute.xlu1 %527  ;;  %v1750_v19 = vpop.permute.xlu0 %522 }
  0xa9   : > { %v792_v20 = vpop.permute.xlu1 %791  ;;  %v787_v21 = vpop.permute.xlu0 %786 }
  0xad   : > { %v802_v22 = vpop.permute.xlu1 %801  ;;  %v797_v23 = vpop.permute.xlu0 %796 }
  0xb1   : > { %v812_v24 = vpop.permute.xlu1 %811  ;;  %v807_v26 = vpop.permute.xlu0 %806 }
  0xb5   : > { %v822_v32 = vpop.permute.xlu1 %821  ;;  %v817_v43 = vpop.permute.xlu0 %816 }
  0xb9   : > { %v832_v52 = vpop.permute.xlu1 %831  ;;  %v827_v3 = vpop.permute.xlu0 %826 }
  0xd4   : > { %v1355_v25 = vpop.f32.mrf.mxu1 }
  0xd5   : > { %v988_v27 = vadd.f32 %v1355_v25, %v792_v20  ;;  %v1329_v30 = vpop.f32.mrf.mxu0 }
  0xd6   : > { %v982_v31 = vpop.f32.mrf.mxu1  ;;  %v655_v33 = vadd.f32 %v1329_v30, %v458_v7 }
  0xd7   : > { %v983_v34 = vadd.f32 %v982_v31, %v787_v21  ;;  %v649_v35 = vpop.f32.mrf.mxu0  ;;  %v1068_v37 = vmul.f32 %v1762_v29, %v988_v27 }
  0xd8   : > { %v1358_v36 = vpop.f32.mrf.mxu1  ;;  %v735_v38 = vmul.f32 %v1760_v28, %v655_v33  ;;  %v650_v39 = vadd.f32 %v649_v35, %v453_v5 }
  0xd9   : > { %v998_v40 = vadd.f32 %v1358_v36, %v802_v22  ;;  %v1332_v41 = vpop.f32.mrf.mxu0  ;;  %v1067_v45 = vmul.f32 %v1762_v29, %v983_v34  ;;  %v842_v22 = vpop.permute.xlu1 %841 }
  0xda   : > { %v992_v42 = vpop.f32.mrf.mxu1  ;;  %v1084_v44 = vadd.f32 %v1068_v37, %v735_v38  ;;  %v734_v46 = vmul.f32 %v1760_v28, %v650_v39  ;;  %v665_v47 = vadd.f32 %v1332_v41, %v468_v6  ;;  %v837_v37 = vpop.permute.xlu0 %836 }
  0xdb   : > { %v1070_v48 = vmul.f32 %v1762_v29, %v998_v40  ;;  %v993_v49 = vadd.f32 %v992_v42, %v797_v23  ;;  %v659_v50 = vpop.f32.mrf.mxu0 }
  0xdc   : > { %v1361_v51 = vpop.f32.mrf.mxu1  ;;  %1101 = vst.msk [vmem:[%s1770_s10 + $0x8] sm:$0xff] %vm1099_vm3, %v1084_v44  ;;  %v1083_v53 = vadd.f32 %v1067_v45, %v734_v46  ;;  %v737_v54 = vmul.f32 %v1760_v28, %v665_v47  ;;  %v660_v55 = vadd.f32 %v659_v50, %v463_v4 }
  0xdd   : > { %v1008_v56 = vadd.f32 %v1361_v51, %v812_v24  ;;  %v1335_v57 = vpop.f32.mrf.mxu0  ;;  %v1069_v60 = vmul.f32 %v1762_v29, %v993_v49 }
  0xde   : > { %v1002_v58 = vpop.f32.mrf.mxu1  ;;  %1100 = vst.msk [vmem:[%s1770_s10] sm:$0xff] %vm1099_vm3, %v1083_v53  ;;  %v1086_v59 = vadd.f32 %v1070_v48, %v737_v54  ;;  %v736_v61 = vmul.f32 %v1760_v28, %v660_v55  ;;  %v675_v62 = vadd.f32 %v1335_v57, %v478_v8 }
  0xdf   : > { %v1072_v63 = vmul.f32 %v1762_v29, %v1008_v56  ;;  %v1003_v0 = vadd.f32 %v1002_v58, %v807_v26  ;;  %v669_v1 = vpop.f32.mrf.mxu0  ;;  %v847_v58 = vpop.permute.xlu0 %846 }
  0xe0   : > { %v1364_v2 = vpop.f32.mrf.mxu1  ;;  %1103 = vst.msk [vmem:[%s1770_s10 + $0x18] sm:$0xff] %vm1099_vm3, %v1086_v59  ;;  %v1085_v4 = vadd.f32 %v1069_v60, %v736_v61  ;;  %v739_v5 = vmul.f32 %v1760_v28, %v675_v62  ;;  %v670_v6 = vadd.f32 %v669_v1, %v1730_v9 }
  0xe1   : > { %v1018_v7 = vadd.f32 %v1364_v2, %v822_v32  ;;  %v1338_v20 = vpop.f32.mrf.mxu0  ;;  %v1071_v23 = vmul.f32 %v1762_v29, %v1003_v0 }
  0xe2   : > { %v1012_v21 = vpop.f32.mrf.mxu1  ;;  %1102 = vst.msk [vmem:[%s1770_s10 + $0x10] sm:$0xff] %vm1099_vm3, %v1085_v4  ;;  %v1088_v8 = vadd.f32 %v1072_v63, %v739_v5  ;;  %v738_v24 = vmul.f32 %v1760_v28, %v670_v6  ;;  %v685_v25 = vadd.f32 %v1338_v20, %v1732_v10 }
  0xe3   : > { %v1074_v26 = vmul.f32 %v1762_v29, %v1018_v7  ;;  %v1013_v27 = vadd.f32 %v1012_v21, %v817_v43  ;;  %v679_v30 = vpop.f32.mrf.mxu0 }
  0xe4   : > { %v1367_v31 = vpop.f32.mrf.mxu1  ;;  %1105 = vst.msk [vmem:[%s1770_s10 + $0x28] sm:$0xff] %vm1099_vm3, %v1088_v8  ;;  %v1087_v9 = vadd.f32 %v1071_v23, %v738_v24  ;;  %v741_v32 = vmul.f32 %v1760_v28, %v685_v25  ;;  %v680_v33 = vadd.f32 %v679_v30, %v1734_v11  ;;  %v852_v11 = vpop.permute.xlu1 %851 }
  0xe5   : > { %v1028_v34 = vadd.f32 %v1367_v31, %v832_v52  ;;  %v1341_v35 = vpop.f32.mrf.mxu0  ;;  %v1073_v38 = vmul.f32 %v1762_v29, %v1013_v27  ;;  %v857_v24 = vpop.permute.xlu0 %856 }
  0xe6   : > { %v1022_v36 = vpop.f32.mrf.mxu1  ;;  %1104 = vst.msk [vmem:[%s1770_s10 + $0x20] sm:$0xff] %vm1099_vm3, %v1087_v9  ;;  %v1090_v10 = vadd.f32 %v1074_v26, %v741_v32  ;;  %v740_v39 = vmul.f32 %v1760_v28, %v680_v33  ;;  %v695_v40 = vadd.f32 %v1341_v35, %v1736_v12 }
  0xe7   : > { %v1076_v41 = vmul.f32 %v1762_v29, %v1028_v34  ;;  %v1023_v42 = vadd.f32 %v1022_v36, %v827_v3  ;;  %v689_v43 = vpop.f32.mrf.mxu0 }
  0xe8   : > { %v1370_v44 = vpop.f32.mrf.mxu1  ;;  %1107 = vst.msk [vmem:[%s1770_s10 + $0x38] sm:$0xff] %vm1099_vm3, %v1090_v10  ;;  %v1089_v45 = vadd.f32 %v1073_v38, %v740_v39  ;;  %v743_v46 = vmul.f32 %v1760_v28, %v695_v40  ;;  %v690_v47 = vadd.f32 %v689_v43, %v1738_v13  ;;  %v862_v0 = vpop.permute.xlu1 %861 }
  0xe9   : > { %v1038_v48 = vadd.f32 %v1370_v44, %v842_v22  ;;  %v1344_v49 = vpop.f32.mrf.mxu0  ;;  %v1075_v51 = vmul.f32 %v1762_v29, %v1023_v42 }
  0xea   : > { %v1032_v50 = vpop.f32.mrf.mxu1  ;;  %1106 = vst.msk [vmem:[%s1770_s10 + $0x30] sm:$0xff] %vm1099_vm3, %v1089_v45  ;;  %v1092_v12 = vadd.f32 %v1076_v41, %v743_v46  ;;  %v742_v52 = vmul.f32 %v1760_v28, %v690_v47  ;;  %v705_v53 = vadd.f32 %v1344_v49, %v1740_v14 }
  0xeb   : > { %v1078_v54 = vmul.f32 %v1762_v29, %v1038_v48  ;;  %v1033_v55 = vadd.f32 %v1032_v50, %v837_v37  ;;  %v699_v56 = vpop.f32.mrf.mxu0 }
  0xec   : > { %v1373_v57 = vpop.f32.mrf.mxu1  ;;  %1109 = vst.msk [vmem:[%s1770_s10 + $0x48] sm:$0xff] %vm1099_vm3, %v1092_v12  ;;  %v1091_v13 = vadd.f32 %v1075_v51, %v742_v52  ;;  %v745_v59 = vmul.f32 %v1760_v28, %v705_v53  ;;  %v700_v60 = vadd.f32 %v699_v56, %v1742_v15 }
  0xed   : > { %v1048_v61 = vadd.f32 %v1373_v57, %v852_v11  ;;  %v1347_v62 = vpop.f32.mrf.mxu0  ;;  %v1077_v1 = vmul.f32 %v1762_v29, %v1033_v55 }
  0xee   : > { %v1042_v63 = vpop.f32.mrf.mxu1  ;;  %1108 = vst.msk [vmem:[%s1770_s10 + $0x40] sm:$0xff] %vm1099_vm3, %v1091_v13  ;;  %v1094_v14 = vadd.f32 %v1078_v54, %v745_v59  ;;  %v744_v2 = vmul.f32 %v1760_v28, %v700_v60  ;;  %v715_v3 = vadd.f32 %v1347_v62, %v1744_v16 }
  0xef   : > { %v1080_v4 = vmul.f32 %v1762_v29, %v1048_v61  ;;  %v1043_v5 = vadd.f32 %v1042_v63, %v847_v58  ;;  %v709_v6 = vpop.f32.mrf.mxu0 }
  0xf0   : > { %v1376_v7 = vpop.f32.mrf.mxu1  ;;  %1111 = vst.msk [vmem:[%s1770_s10 + $0x58] sm:$0xff] %vm1099_vm3, %v1094_v14  ;;  %v1093_v15 = vadd.f32 %v1077_v1, %v744_v2  ;;  %v747_v20 = vmul.f32 %v1760_v28, %v715_v3  ;;  %v710_v21 = vadd.f32 %v709_v6, %v1746_v17 }
  0xf1   : > { %v1058_v22 = vadd.f32 %v1376_v7, %v862_v0  ;;  %v1350_v8 = vpop.f32.mrf.mxu0  ;;  %v1079_v25 = vmul.f32 %v1762_v29, %v1043_v5 }
  0xf2   : > { %v1052_v23 = vpop.f32.mrf.mxu1  ;;  %1110 = vst.msk [vmem:[%s1770_s10 + $0x50] sm:$0xff] %vm1099_vm3, %v1093_v15  ;;  %v1096_v16 = vadd.f32 %v1080_v4, %v747_v20  ;;  %v746_v26 = vmul.f32 %v1760_v28, %v710_v21  ;;  %v725_v27 = vadd.f32 %v1350_v8, %v1748_v18 }
  0xf3   : > { %v1053_v30 = vadd.f32 %v1052_v23, %v857_v24  ;;  %v719_v31 = vpop.f32.mrf.mxu0  ;;  %v1082_v9 = vmul.f32 %v1762_v29, %v1058_v22 }
  0xf4   : > { %1113 = vst.msk [vmem:[%s1770_s10 + $0x68] sm:$0xff] %vm1099_vm3, %v1096_v16  ;;  %v1095_v17 = vadd.f32 %v1079_v25, %v746_v26  ;;  %v749_v32 = vmul.f32 %v1760_v28, %v725_v27  ;;  %v720_v33 = vadd.f32 %v719_v31, %v1750_v19 }
  0xf5   : > { %v1081_v35 = vmul.f32 %v1762_v29, %v1053_v30 }
  0xf6   : > { %1112 = vst.msk [vmem:[%s1770_s10 + $0x60] sm:$0xff] %vm1099_vm3, %v1095_v17  ;;  %v1098_v34 = vadd.f32 %v1082_v9, %v749_v32  ;;  %v748_v36 = vmul.f32 %v1760_v28, %v720_v33 }
  0xf8   : > { %1115 = vst.msk [vmem:[%s1770_s10 + $0x78] sm:$0xff] %vm1099_vm3, %v1098_v34  ;;  %v1097_v18 = vadd.f32 %v1081_v35, %v748_v36 }
  0xfa   : > { %1114 = vst.msk [vmem:[%s1770_s10 + $0x70] sm:$0xff] %vm1099_vm3, %v1097_v18 }
  0xfb PF: > { %s18_s29 = sadd.s32 1, %s1426_s29   ;;  %s1863_s27 = smov %s1422_s28 }
  0xfc   : > { %p15_p5 = scmp.ge.s32.totalorder %s18_s29, 4   ;;  %s1864_s28 = smov %s1866_s30 }
  0xfe   :  { %17 = sbr.rel (!%p15_p5) target bundleno = 2 (0x2), region = 91 }

</bundles_post_ra>
